<compile_context>
chip_gen: v6e
topology: v6e:2x2x1
jax: 0.10.0
libtpu: 0.0.40
codegen_flags: <defaults>
</compile_context>

<pallas_src>
import functools

import jax
import jax.numpy as jnp
from jax import lax
from jax.experimental import pallas as pl
from jax.experimental.pallas import tpu as pltpu

BN_EPS = 1e-5


def _round_up(x, m):
    return -(-x // m) * m


def _gcn_layer1_kernel(a_ref, xw1_ref, s1_ref, w2_ref, g_ref, acc_ref):
    """Grid (i, k): acc += A[i,k] @ XW1'[k]; at last k: G[i] = relu(acc + s1) @ W2'."""
    k = pl.program_id(1)

    @pl.when(k == 0)
    def _():
        acc_ref[...] = jnp.zeros_like(acc_ref)

    acc_ref[...] += jnp.dot(a_ref[...], xw1_ref[...],
                            preferred_element_type=jnp.float32)

    @pl.when(k == pl.num_programs(1) - 1)
    def _():
        h1 = jnp.maximum(acc_ref[...] + s1_ref[...], 0.0)   # ReLU; dropout = identity (eval)
        g = jnp.dot(h1.astype(jnp.bfloat16), w2_ref[...],
                    preferred_element_type=jnp.float32)
        g_ref[...] = g.astype(g_ref.dtype)                   # bf16 intermediate


def _gcn_layer2_head_kernel(a_ref, g_ref, s2_ref, wf_ref, bf_ref, out_ref, acc_ref):
    """Grid (i, k): acc += A[i,k] @ G[k]; at last k: H2 = relu(acc + s2);
    P = H2 @ Wf + bf; gaussian head written as one lane-dense (tm, 128) store."""
    k = pl.program_id(1)

    @pl.when(k == 0)
    def _():
        acc_ref[...] = jnp.zeros_like(acc_ref)

    acc_ref[...] += jnp.dot(a_ref[...], g_ref[...],
                            preferred_element_type=jnp.float32)

    @pl.when(k == pl.num_programs(1) - 1)
    def _():
        h2 = jnp.maximum(acc_ref[...] + s2_ref[...], 0.0)
        p = jnp.dot(h2.astype(jnp.bfloat16), wf_ref[...],
                    preferred_element_type=jnp.float32) + bf_ref[...]
        # Gaussian head: lane 0 = mu (output_activation=None), lane 1 = softplus + 1e-6.
        sp = jnp.maximum(p, 0.0) + jnp.log1p(jnp.exp(-jnp.abs(p))) + 1e-6
        lane = lax.broadcasted_iota(jnp.int32, p.shape, 1)
        out_ref[...] = jnp.where(lane == 1, sp, p)


@functools.partial(jax.jit, static_argnames=("n_nodes",))
def gnn_decoder_forward(x_latent, batch_latent, edge_index, params, *, n_nodes):
    """GNNDecoder.forward with pooling_details_list = [] (eval mode)."""
    n, d0 = x_latent.shape
    h1 = params["w1"].shape[1]
    h2 = params["w2"].shape[1]
    p_out = params["wf"].shape[1]
    assert p_out == 2, "gaussian head expects 2 output params per gene"

    # ---- fold eval-mode BatchNorm + GCN bias into the weights (exact, f32) ----
    scale1 = params["g1"] * lax.rsqrt(params["rv1"] + BN_EPS)          # [1, H1]
    w1f = params["w1"] * scale1                                        # [D0, H1]
    s1 = (params["b1"] - params["rm1"]) * scale1 + params["beta1"]     # [1, H1]
    scale2 = params["g2"] * lax.rsqrt(params["rv2"] + BN_EPS)          # [1, H2]
    w2f = params["w2"] * scale2                                        # [H1, H2]
    s2 = (params["b2"] - params["rm2"]) * scale2 + params["beta2"]     # [1, H2]

    # ---- tile sizes: lane dims multiples of 128, >=2 row tiles for megacore ----
    n_pad128 = _round_up(max(n_nodes, 128), 128)
    tk = min(512, n_pad128)                  # contraction tile (lane dim of A)
    n_pad = _round_up(n_pad128, tk)
    tm = min(256, n_pad // 2)                # >=2 row tiles -> both v7x TCs used
    h1p = _round_up(h1, 128)
    h2p = _round_up(h2, 128)
    pp = _round_up(p_out, 128)

    # ---- GCN-normalized adjacency D^-1/2 (A+I) D^-1/2, built in O(E) + one
    #      pre-padded bf16 N^2 buffer (fused normalization + cast) ----
    src = edge_index[0].astype(jnp.int32)
    dst = edge_index[1].astype(jnp.int32)
    deg = jnp.zeros((n_nodes,), jnp.float32).at[dst].add(1.0) + 1.0    # + self loop
    dinv = lax.rsqrt(deg)                                              # deg >= 1
    vals = (dinv[dst] * dinv[src]).astype(jnp.bfloat16)
    diag = (dinv * dinv).astype(jnp.bfloat16)
    ar = jnp.arange(n_nodes, dtype=jnp.int32)
    a_bf = (jnp.zeros((n_pad, n_pad), jnp.bfloat16)
            .at[dst, src].add(vals)
            .at[ar, ar].add(diag))

    # ---- precompute XW1' (f32 matmul in XLA), pad everything, cast streams to bf16 ----
    xw1 = jnp.dot(x_latent.astype(jnp.float32), w1f)                   # [N, H1] f32
    xw1_bf = jnp.zeros((n_pad, h1p), jnp.bfloat16).at[:n_nodes, :h1].set(
        xw1.astype(jnp.bfloat16))
    s1p = jnp.zeros((1, h1p), jnp.float32).at[:, :h1].set(s1)
    w2_bf = jnp.zeros((h1p, h2p), jnp.bfloat16).at[:h1, :h2].set(w2f.astype(jnp.bfloat16))
    s2p = jnp.zeros((1, h2p), jnp.float32).at[:, :h2].set(s2)
    wf_bf = jnp.zeros((h2p, pp), jnp.bfloat16).at[:h2, :p_out].set(
        params["wf"].astype(jnp.bfloat16))
    bfp = jnp.zeros((1, pp), jnp.float32).at[:, :p_out].set(params["bf"])

    grid = (n_pad // tm, n_pad // tk)
    cparams = pltpu.CompilerParams(
        dimension_semantics=("parallel", "arbitrary"),   # k (reduction) last, arbitrary
        vmem_limit_bytes=32 * 1024 * 1024,               # fits v5e/v6e/v7x budgets
    )

    # ---- call 1: H1 = relu(A @ XW1' + s1); G = H1 @ W2'  (G resident across k) ----
    cost1 = pl.CostEstimate(
        flops=int(2 * n_pad * n_pad * h1p + 2 * n_pad * h1p * h2p),
        transcendentals=0,
        bytes_accessed=int(2 * n_pad * n_pad + 2 * n_pad * h1p + 2 * n_pad * h2p),
    )
    g_inter = pl.pallas_call(
        _gcn_layer1_kernel,
        out_shape=jax.ShapeDtypeStruct((n_pad, h2p), jnp.bfloat16),
        grid=grid,
        in_specs=[
            pl.BlockSpec((tm, tk), lambda i, k: (i, k)),     # A tile
            pl.BlockSpec((tk, h1p), lambda i, k: (k, 0)),    # XW1' tile
            pl.BlockSpec((1, h1p), lambda i, k: (0, 0)),     # shift1 (BN-folded)
            pl.BlockSpec((h1p, h2p), lambda i, k: (0, 0)),   # W2' (BN-folded)
        ],
        out_specs=pl.BlockSpec((tm, h2p), lambda i, k: (i, 0)),
        scratch_shapes=[pltpu.VMEM((tm, h1p), jnp.float32)],
        compiler_params=cparams,
        cost_estimate=cost1,
    )(a_bf, xw1_bf, s1p, w2_bf)

    # ---- call 2: H2 = relu(A @ G + s2); P = H2 @ Wf + bf; gaussian head ----
    cost2 = pl.CostEstimate(
        flops=int(2 * n_pad * n_pad * h2p + 2 * n_pad * h2p * pp),
        transcendentals=int(n_pad * pp),
        bytes_accessed=int(2 * n_pad * n_pad + 2 * n_pad * h2p + 4 * n_pad * pp),
    )
    out_pad = pl.pallas_call(
        _gcn_layer2_head_kernel,
        out_shape=jax.ShapeDtypeStruct((n_pad, pp), jnp.float32),
        grid=grid,
        in_specs=[
            pl.BlockSpec((tm, tk), lambda i, k: (i, k)),     # A tile
            pl.BlockSpec((tk, h2p), lambda i, k: (k, 0)),    # G tile (bf16)
            pl.BlockSpec((1, h2p), lambda i, k: (0, 0)),     # shift2
            pl.BlockSpec((h2p, pp), lambda i, k: (0, 0)),    # Wf (lane-padded)
            pl.BlockSpec((1, pp), lambda i, k: (0, 0)),      # bf (lane-padded)
        ],
        out_specs=pl.BlockSpec((tm, pp), lambda i, k: (i, 0)),
        scratch_shapes=[pltpu.VMEM((tm, h2p), jnp.float32)],
        compiler_params=cparams,
        cost_estimate=cost2,
    )(a_bf, g_inter, s2p, wf_bf, bfp)

    # current_batch is returned unchanged (no pooling details)
    return out_pad[:n_nodes, :p_out], batch_latent


def reference_forward(x, edge_index, params, n):
    """Pure-JAX f32 reference (PyTorch semantics, eval mode)."""
    src, dst = edge_index[0], edge_index[1]
    a = jnp.zeros((n, n), jnp.float32).at[dst, src].add(1.0) + jnp.eye(n, dtype=jnp.float32)
    deg = a.sum(1)
    dinv = jnp.where(deg > 0, lax.rsqrt(deg), 0.0)
    a_hat = dinv[:, None] * a * dinv[None, :]

    def bn(h, g, beta, rm, rv):
        return (h - rm) * g * lax.rsqrt(rv + BN_EPS) + beta

    h = a_hat @ (x @ params["w1"]) + params["b1"]
    h = jnp.maximum(bn(h, params["g1"], params["beta1"], params["rm1"], params["rv1"]), 0.0)
    h = a_hat @ (h @ params["w2"]) + params["b2"]
    h = jnp.maximum(bn(h, params["g2"], params["beta2"], params["rm2"], params["rv2"]), 0.0)
    p = h @ params["wf"] + params["bf"]
    mu = p[:, 0]
    std = jax.nn.softplus(p[:, 1]) + 1e-6
    return jnp.stack([mu, std], axis=-1)


def init_params(key, latent_dim, hidden_dims, output_params_per_gene):
    d0, (h1, h2), p = latent_dim, hidden_dims, output_params_per_gene
    ks = jax.random.split(key, 12)
    f32 = jnp.float32
    return {
        "w1": 0.2 * jax.random.normal(ks[0], (d0, h1), f32),
        "b1": 0.05 * jax.random.normal(ks[1], (1, h1), f32),
        "g1": 1.0 + 0.1 * jax.random.normal(ks[2], (1, h1), f32),
        "beta1": 0.1 * jax.random.normal(ks[3], (1, h1), f32),
        "rm1": 0.1 * jax.random.normal(ks[4], (1, h1), f32),
        "rv1": 1.0 + 0.1 * jnp.abs(jax.random.normal(ks[5], (1, h1), f32)),
        "w2": 0.2 * jax.random.normal(ks[6], (h1, h2), f32),
        "b2": 0.05 * jax.random.normal(ks[7], (1, h2), f32),
        "g2": 1.0 + 0.1 * jax.random.normal(ks[8], (1, h2), f32),
        "beta2": 0.1 * jax.random.normal(ks[9], (1, h2), f32),
        "rm2": 0.1 * jax.random.normal(ks[10], (1, h2), f32),
        "rv2": 1.0 + 0.1 * jnp.abs(jax.random.normal(ks[11], (1, h2), f32)),
        "wf": 0.2 * jax.random.normal(jax.random.PRNGKey(100), (h2, p), f32),
        "bf": 0.05 * jax.random.normal(jax.random.PRNGKey(101), (1, p), f32),
    }


if __name__ == "__main__":
    # Small config: latent_dim=32, gnn_hidden_dims=[64, 32], output_params_per_gene=2,
    # GCNConv, relu, output_activation=None, distribution_type='gaussian'.
    # Graph: 16 nodes, bidirectional ring + a few chords (48 directed edges).
    N, LATENT, HIDDEN, P_OUT = 16, 32, (64, 32), 2

    key = jax.random.PRNGKey(0)
    kx, kp = jax.random.split(key)

    x_latent = jax.random.normal(kx, (N, LATENT), jnp.float32)
    batch_latent = jnp.zeros((N,), jnp.int32)

    ring_src = jnp.arange(N, dtype=jnp.int32)
    ring_dst = (ring_src + 1) % N
    chord_src = jnp.arange(0, N, 2, dtype=jnp.int32)
    chord_dst = (chord_src + 5) % N
    src = jnp.concatenate([ring_src, ring_dst, chord_src, chord_dst])
    dst = jnp.concatenate([ring_dst, ring_src, chord_dst, chord_src])
    edge_index = jnp.stack([src, dst], axis=0)

    params = init_params(kp, LATENT, HIDDEN, P_OUT)

    recon, out_batch = gnn_decoder_forward(
        x_latent, batch_latent, edge_index, params, n_nodes=N)
    recon = jax.block_until_ready(recon)

    ref = reference_forward(x_latent, edge_index, params, N)

    assert recon.shape == (N, P_OUT)
    assert out_batch.shape == (N,)
    assert bool(jnp.all(recon[:, 1] > 0.0))            # std must be positive
    max_err = float(jnp.max(jnp.abs(recon - ref)))      # bf16 streams -> ~1e-2 expected
    assert max_err < 8e-2, f"max abs err {max_err}"
    print("KERNEL_OK")
</pallas_src>

<mosaic_0001>
module attributes {stable_mosaic.version = 11 : i64} {
  func.func private @main(%arg0: i32) attributes {dimension_semantics = [#tpu.dimension_semantics<core_parallel>], iteration_bounds = array<i64: 2>, tpu.core_type = #tpu.core_type<sc_scalar_subcore>, window_params = []} {
    return
  }
}

module attributes {stable_mosaic.version = 11 : i64} {
  func.func private @main(%arg0: i32) attributes {dimension_semantics = [#tpu.dimension_semantics<core_parallel>], iteration_bounds = array<i64: 2>, tpu.core_type = #tpu.core_type<sc_scalar_subcore>, window_params = []} {
    return
  }
}

module attributes {stable_mosaic.version = 11 : i64} {
  func.func @_gcn_layer1_kernel(%arg0: i32, %arg1: i32, %arg2: memref<64x128xbf16, #tpu.memory_space<vmem>>, %arg3: memref<128x128xbf16, #tpu.memory_space<vmem>>, %arg4: memref<1x128xf32, #tpu.memory_space<vmem>>, %arg5: memref<128x128xbf16, #tpu.memory_space<vmem>>, %arg6: memref<64x128xbf16, #tpu.memory_space<vmem>>, %arg7: memref<64x128xf32, #tpu.memory_space<vmem>>) attributes {dimension_semantics = [#tpu.dimension_semantics<parallel>, #tpu.dimension_semantics<arbitrary>], iteration_bounds = array<i64: 2, 1>, scalar_prefetch = 0 : i64, scratch_operands = 1 : i64, tpu.core_type = #tpu.core_type<tc>, window_params = [{transform_indices = @transform_0, window_bounds = array<i64: 64, 128>}, {transform_indices = @transform_1, window_bounds = array<i64: 128, 128>}, {pipeline_mode = #tpu.pipeline_mode<synchronous>, transform_indices = @transform_2, window_bounds = array<i64: 1, 128>}, {pipeline_mode = #tpu.pipeline_mode<synchronous>, transform_indices = @transform_3, window_bounds = array<i64: 128, 128>}, {transform_indices = @transform_4, window_bounds = array<i64: 64, 128>}]} {
    %c0_i32 = arith.constant 0 : i32
    %0 = arith.cmpi eq, %arg1, %c0_i32 : i32
    %1 = arith.extui %0 : i1 to i32
    %c0_i32_0 = arith.constant 0 : i32
    %2 = arith.cmpi ne, %1, %c0_i32_0 : i32
    scf.if %2 {
      %cst_10 = arith.constant 0.000000e+00 : f32
      %12 = vector.broadcast %cst_10 : f32 to vector<64x128xf32>
      %c0_11 = arith.constant 0 : index
      %c0_12 = arith.constant 0 : index
      %13 = vector.load %arg7[%c0_11, %c0_12] : memref<64x128xf32, #tpu.memory_space<vmem>>, vector<64x128xf32>
      tpu.vector_store %arg7[%c0_11, %c0_12], %12 {strides = array<i32>} : memref<64x128xf32, #tpu.memory_space<vmem>>, vector<64x128xf32>,
    } else {
    }
    %c0 = arith.constant 0 : index
    %c0_1 = arith.constant 0 : index
    %3 = vector.load %arg7[%c0, %c0_1] : memref<64x128xf32, #tpu.memory_space<vmem>>, vector<64x128xf32>
    %c0_2 = arith.constant 0 : index
    %c0_3 = arith.constant 0 : index
    %4 = vector.load %arg2[%c0_2, %c0_3] : memref<64x128xbf16, #tpu.memory_space<vmem>>, vector<64x128xbf16>
    %c0_4 = arith.constant 0 : index
    %c0_5 = arith.constant 0 : index
    %5 = vector.load %arg3[%c0_4, %c0_5] : memref<128x128xbf16, #tpu.memory_space<vmem>>, vector<128x128xbf16>
    %cst = arith.constant dense<0.000000e+00> : vector<64x128xf32>
    %6 = tpu.matmul %4, %5, %cst {dimension_numbers = #tpu.dot_dimension_numbers<[1], [0], [0], [1], [0, 0, 1, 1], [], []>} : vector<64x128xbf16>, vector<128x128xbf16>, vector<64x128xf32> -> vector<64x128xf32>
    %7 = arith.addf %3, %6 : vector<64x128xf32>
    %c0_6 = arith.constant 0 : index
    %c0_7 = arith.constant 0 : index
    %8 = vector.load %arg7[%c0_6, %c0_7] : memref<64x128xf32, #tpu.memory_space<vmem>>, vector<64x128xf32>
    tpu.vector_store %arg7[%c0_6, %c0_7], %7 {strides = array<i32>} : memref<64x128xf32, #tpu.memory_space<vmem>>, vector<64x128xf32>,
    %c0_i32_8 = arith.constant 0 : i32
    %9 = arith.cmpi eq, %arg1, %c0_i32_8 : i32
    %10 = arith.extui %9 : i1 to i32
    %c0_i32_9 = arith.constant 0 : i32
    %11 = arith.cmpi ne, %10, %c0_i32_9 : i32
    scf.if %11 {
      %c0_10 = arith.constant 0 : index
      %c0_11 = arith.constant 0 : index
      %12 = vector.load %arg7[%c0_10, %c0_11] : memref<64x128xf32, #tpu.memory_space<vmem>>, vector<64x128xf32>
      %c0_12 = arith.constant 0 : index
      %c0_13 = arith.constant 0 : index
      %13 = vector.load %arg4[%c0_12, %c0_13] : memref<1x128xf32, #tpu.memory_space<vmem>>, vector<1x128xf32>
      %14 = vector.broadcast %13 : vector<1x128xf32> to vector<64x128xf32>
      %15 = arith.addf %12, %14 : vector<64x128xf32>
      %cst_14 = arith.constant 0.000000e+00 : f32
      %16 = vector.broadcast %cst_14 : f32 to vector<64x128xf32>
      %17 = arith.maximumf %15, %16 : vector<64x128xf32>
      %18 = arith.truncf %17 : vector<64x128xf32> to vector<64x128xbf16>
      %c0_15 = arith.constant 0 : index
      %c0_16 = arith.constant 0 : index
      %19 = vector.load %arg5[%c0_15, %c0_16] : memref<128x128xbf16, #tpu.memory_space<vmem>>, vector<128x128xbf16>
      %cst_17 = arith.constant dense<0.000000e+00> : vector<64x128xf32>
      %20 = tpu.matmul %18, %19, %cst_17 {dimension_numbers = #tpu.dot_dimension_numbers<[1], [0], [0], [1], [0, 0, 1, 1], [], []>} : vector<64x128xbf16>, vector<128x128xbf16>, vector<64x128xf32> -> vector<64x128xf32>
      %21 = arith.truncf %20 : vector<64x128xf32> to vector<64x128xbf16>
      %c0_18 = arith.constant 0 : index
      %c0_19 = arith.constant 0 : index
      %22 = vector.load %arg6[%c0_18, %c0_19] : memref<64x128xbf16, #tpu.memory_space<vmem>>, vector<64x128xbf16>
      tpu.vector_store %arg6[%c0_18, %c0_19], %21 {strides = array<i32>} : memref<64x128xbf16, #tpu.memory_space<vmem>>, vector<64x128xbf16>,
    } else {
    }
    return
  }
  func.func @transform_0(%arg0: i32, %arg1: i32) -> (i32, i32) {
    %c0_i32 = arith.constant 0 : i32
    return %arg0, %arg1 : i32, i32
  }
  func.func @transform_1(%arg0: i32, %arg1: i32) -> (i32, i32) {
    %c0_i32 = arith.constant 0 : i32
    %c0_i32_0 = arith.constant 0 : i32
    return %arg1, %c0_i32 : i32, i32
  }
  func.func @transform_2(%arg0: i32, %arg1: i32) -> (i32, i32) {
    %c0_i32 = arith.constant 0 : i32
    %c0_i32_0 = arith.constant 0 : i32
    %c0_i32_1 = arith.constant 0 : i32
    return %c0_i32, %c0_i32_0 : i32, i32
  }
  func.func @transform_3(%arg0: i32, %arg1: i32) -> (i32, i32) {
    %c0_i32 = arith.constant 0 : i32
    %c0_i32_0 = arith.constant 0 : i32
    %c0_i32_1 = arith.constant 0 : i32
    return %c0_i32, %c0_i32_0 : i32, i32
  }
  func.func @transform_4(%arg0: i32, %arg1: i32) -> (i32, i32) {
    %c0_i32 = arith.constant 0 : i32
    %c0_i32_0 = arith.constant 0 : i32
    return %arg0, %c0_i32 : i32, i32
  }
}

module attributes {stable_mosaic.version = 11 : i64} {
  func.func @_gcn_layer2_head_kernel(%arg0: i32, %arg1: i32, %arg2: memref<64x128xbf16, #tpu.memory_space<vmem>>, %arg3: memref<128x128xbf16, #tpu.memory_space<vmem>>, %arg4: memref<1x128xf32, #tpu.memory_space<vmem>>, %arg5: memref<128x128xbf16, #tpu.memory_space<vmem>>, %arg6: memref<1x128xf32, #tpu.memory_space<vmem>>, %arg7: memref<64x128xf32, #tpu.memory_space<vmem>>, %arg8: memref<64x128xf32, #tpu.memory_space<vmem>>) attributes {dimension_semantics = [#tpu.dimension_semantics<parallel>, #tpu.dimension_semantics<arbitrary>], iteration_bounds = array<i64: 2, 1>, scalar_prefetch = 0 : i64, scratch_operands = 1 : i64, tpu.core_type = #tpu.core_type<tc>, window_params = [{transform_indices = @transform_0, window_bounds = array<i64: 64, 128>}, {transform_indices = @transform_1, window_bounds = array<i64: 128, 128>}, {pipeline_mode = #tpu.pipeline_mode<synchronous>, transform_indices = @transform_2, window_bounds = array<i64: 1, 128>}, {pipeline_mode = #tpu.pipeline_mode<synchronous>, transform_indices = @transform_3, window_bounds = array<i64: 128, 128>}, {pipeline_mode = #tpu.pipeline_mode<synchronous>, transform_indices = @transform_4, window_bounds = array<i64: 1, 128>}, {transform_indices = @transform_5, window_bounds = array<i64: 64, 128>}]} {
    %c0_i32 = arith.constant 0 : i32
    %0 = arith.cmpi eq, %arg1, %c0_i32 : i32
    %1 = arith.extui %0 : i1 to i32
    %c0_i32_0 = arith.constant 0 : i32
    %2 = arith.cmpi ne, %1, %c0_i32_0 : i32
    scf.if %2 {
      %cst_10 = arith.constant 0.000000e+00 : f32
      %12 = vector.broadcast %cst_10 : f32 to vector<64x128xf32>
      %c0_11 = arith.constant 0 : index
      %c0_12 = arith.constant 0 : index
      %13 = vector.load %arg8[%c0_11, %c0_12] : memref<64x128xf32, #tpu.memory_space<vmem>>, vector<64x128xf32>
      tpu.vector_store %arg8[%c0_11, %c0_12], %12 {strides = array<i32>} : memref<64x128xf32, #tpu.memory_space<vmem>>, vector<64x128xf32>,
    } else {
    }
    %c0 = arith.constant 0 : index
    %c0_1 = arith.constant 0 : index
    %3 = vector.load %arg8[%c0, %c0_1] : memref<64x128xf32, #tpu.memory_space<vmem>>, vector<64x128xf32>
    %c0_2 = arith.constant 0 : index
    %c0_3 = arith.constant 0 : index
    %4 = vector.load %arg2[%c0_2, %c0_3] : memref<64x128xbf16, #tpu.memory_space<vmem>>, vector<64x128xbf16>
    %c0_4 = arith.constant 0 : index
    %c0_5 = arith.constant 0 : index
    %5 = vector.load %arg3[%c0_4, %c0_5] : memref<128x128xbf16, #tpu.memory_space<vmem>>, vector<128x128xbf16>
    %cst = arith.constant dense<0.000000e+00> : vector<64x128xf32>
    %6 = tpu.matmul %4, %5, %cst {dimension_numbers = #tpu.dot_dimension_numbers<[1], [0], [0], [1], [0, 0, 1, 1], [], []>} : vector<64x128xbf16>, vector<128x128xbf16>, vector<64x128xf32> -> vector<64x128xf32>
    %7 = arith.addf %3, %6 : vector<64x128xf32>
    %c0_6 = arith.constant 0 : index
    %c0_7 = arith.constant 0 : index
    %8 = vector.load %arg8[%c0_6, %c0_7] : memref<64x128xf32, #tpu.memory_space<vmem>>, vector<64x128xf32>
    tpu.vector_store %arg8[%c0_6, %c0_7], %7 {strides = array<i32>} : memref<64x128xf32, #tpu.memory_space<vmem>>, vector<64x128xf32>,
    %c0_i32_8 = arith.constant 0 : i32
    %9 = arith.cmpi eq, %arg1, %c0_i32_8 : i32
    %10 = arith.extui %9 : i1 to i32
    %c0_i32_9 = arith.constant 0 : i32
    %11 = arith.cmpi ne, %10, %c0_i32_9 : i32
    scf.if %11 {
      %c0_10 = arith.constant 0 : index
      %c0_11 = arith.constant 0 : index
      %12 = vector.load %arg8[%c0_10, %c0_11] : memref<64x128xf32, #tpu.memory_space<vmem>>, vector<64x128xf32>
      %c0_12 = arith.constant 0 : index
      %c0_13 = arith.constant 0 : index
      %13 = vector.load %arg4[%c0_12, %c0_13] : memref<1x128xf32, #tpu.memory_space<vmem>>, vector<1x128xf32>
      %14 = vector.broadcast %13 : vector<1x128xf32> to vector<64x128xf32>
      %15 = arith.addf %12, %14 : vector<64x128xf32>
      %cst_14 = arith.constant 0.000000e+00 : f32
      %16 = vector.broadcast %cst_14 : f32 to vector<64x128xf32>
      %17 = arith.maximumf %15, %16 : vector<64x128xf32>
      %18 = arith.truncf %17 : vector<64x128xf32> to vector<64x128xbf16>
      %c0_15 = arith.constant 0 : index
      %c0_16 = arith.constant 0 : index
      %19 = vector.load %arg5[%c0_15, %c0_16] : memref<128x128xbf16, #tpu.memory_space<vmem>>, vector<128x128xbf16>
      %cst_17 = arith.constant dense<0.000000e+00> : vector<64x128xf32>
      %20 = tpu.matmul %18, %19, %cst_17 {dimension_numbers = #tpu.dot_dimension_numbers<[1], [0], [0], [1], [0, 0, 1, 1], [], []>} : vector<64x128xbf16>, vector<128x128xbf16>, vector<64x128xf32> -> vector<64x128xf32>
      %c0_18 = arith.constant 0 : index
      %c0_19 = arith.constant 0 : index
      %21 = vector.load %arg6[%c0_18, %c0_19] : memref<1x128xf32, #tpu.memory_space<vmem>>, vector<1x128xf32>
      %22 = vector.broadcast %21 : vector<1x128xf32> to vector<64x128xf32>
      %23 = arith.addf %20, %22 : vector<64x128xf32>
      %cst_20 = arith.constant 0.000000e+00 : f32
      %24 = vector.broadcast %cst_20 : f32 to vector<64x128xf32>
      %25 = arith.maximumf %23, %24 : vector<64x128xf32>
      %26 = math.absf %23 : vector<64x128xf32>
      %cst_21 = arith.constant 0.000000e+00 : f32
      %27 = vector.broadcast %cst_21 : f32 to vector<64x128xf32>
      %28 = arith.subf %27, %26 : vector<64x128xf32>
      %29 = math.exp %28 : vector<64x128xf32>
      %30 = math.log1p %29 : vector<64x128xf32>
      %31 = arith.addf %25, %30 : vector<64x128xf32>
      %cst_22 = arith.constant 9.99999997E-7 : f32
      %32 = vector.broadcast %cst_22 : f32 to vector<64x128xf32>
      %33 = arith.addf %31, %32 : vector<64x128xf32>
      %34 = tpu.iota {dimensions = array<i32: 1>} : vector<64x128xi32>
      %c1_i32 = arith.constant 1 : i32
      %35 = vector.broadcast %c1_i32 : i32 to vector<64x128xi32>
      %36 = arith.cmpi eq, %34, %35 : vector<64x128xi32>
      %37 = arith.select %36, %33, %23 : vector<64x128xi1>, vector<64x128xf32>
      %c0_23 = arith.constant 0 : index
      %c0_24 = arith.constant 0 : index
      %38 = vector.load %arg7[%c0_23, %c0_24] : memref<64x128xf32, #tpu.memory_space<vmem>>, vector<64x128xf32>
      tpu.vector_store %arg7[%c0_23, %c0_24], %37 {strides = array<i32>} : memref<64x128xf32, #tpu.memory_space<vmem>>, vector<64x128xf32>,
    } else {
    }
    return
  }
  func.func @transform_0(%arg0: i32, %arg1: i32) -> (i32, i32) {
    %c0_i32 = arith.constant 0 : i32
    return %arg0, %arg1 : i32, i32
  }
  func.func @transform_1(%arg0: i32, %arg1: i32) -> (i32, i32) {
    %c0_i32 = arith.constant 0 : i32
    %c0_i32_0 = arith.constant 0 : i32
    return %arg1, %c0_i32 : i32, i32
  }
  func.func @transform_2(%arg0: i32, %arg1: i32) -> (i32, i32) {
    %c0_i32 = arith.constant 0 : i32
    %c0_i32_0 = arith.constant 0 : i32
    %c0_i32_1 = arith.constant 0 : i32
    return %c0_i32, %c0_i32_0 : i32, i32
  }
  func.func @transform_3(%arg0: i32, %arg1: i32) -> (i32, i32) {
    %c0_i32 = arith.constant 0 : i32
    %c0_i32_0 = arith.constant 0 : i32
    %c0_i32_1 = arith.constant 0 : i32
    return %c0_i32, %c0_i32_0 : i32, i32
  }
  func.func @transform_4(%arg0: i32, %arg1: i32) -> (i32, i32) {
    %c0_i32 = arith.constant 0 : i32
    %c0_i32_0 = arith.constant 0 : i32
    %c0_i32_1 = arith.constant 0 : i32
    return %c0_i32, %c0_i32_0 : i32, i32
  }
  func.func @transform_5(%arg0: i32, %arg1: i32) -> (i32, i32) {
    %c0_i32 = arith.constant 0 : i32
    %c0_i32_0 = arith.constant 0 : i32
    return %arg0, %c0_i32 : i32, i32
  }
}

</mosaic_0001>

<bundles_post_ra>
// kernel: gnn_decoder_forward.2
= control target key start
LH: loop header
LB: loop body
LE: loop exit
PB: predicated region body
PF: predicated region fallthrough
CT: control target
= control target key end

     0   :  { %s971_s15 = smov 0   ;;  %s973_s16 = smov 0   ;;  %s1068_s0 = inlined_call_operand.vmem [shape: bf16[128,128], index: 0, kind: input, shape index: {}]   ;;  %s1069_s1 = inlined_call_operand.vmem [shape: bf16[128,128], index: 1, kind: input, shape index: {}]   ;;  %s1070_s2 = inlined_call_operand.vmem [shape: f32[1,128], index: 2, kind: input, shape index: {}]   ;;  %s1071_s3 = inlined_call_operand.vmem [shape: bf16[128,128], index: 3, kind: input, shape index: {}]   ;;  %s1072_s4 = inlined_call_operand.vmem [shape: bf16[128,128], index: 4, kind: output, shape index: {}]  }
   0x1   :  { %s975_s17 = smov 0  }
   0x2 LB: > { %s26_s18 = sadd.s32 1, %s940_s16  ;;  %p739_p0 = scmp.ge.s32.totalorder %s944_s17, 1  ;;  %s944_s17 = sphi %s975_s17, %s14_s17   ;;  %s940_s16 = sphi %s973_s16, %s1074_s16   ;;  %s936_s15 = sphi %s971_s15, %s1073_s15  }
   0x3   : > { %p28_p1 = scmp.ge.s32.totalorder %s26_s18, 2  ;;  %p191_p2 = scmp.lt.s32.totalorder %s944_s17, 3 }
   0x5   : > { %s1076_s18 = smov (%p28_p1, %s26_s18), 0  ;;  %p192_p3 = pnand %p739_p0, %p191_p2 }
   0x6   : > { %s740_s21 = sshll.u32 (!%p192_p3), %s936_s15, 3 }
   0x7   : > { %195 = sbr.rel (%p192_p3) target bundleno = 461 (0x1cd), region = 36  ;;  %p226_p4 = scmp.lt.s32.totalorder (!%p192_p3), %s740_s21, 15 }
   0xc   : > { %v902_v0 = vld [vmem:[%s1069_s1 + $0x38] sm:$0xff]   ;;  %v903_v1 = vld [vmem:[%s1069_s1 + $0x30] sm:$0xff]   ;;  %s1078_s21 = smov (!%p226_p4, %s740_s21), 15  ;;  %v904_v2 = vld [vmem:[%s1069_s1 + $0x28] sm:$0xff]  }
   0xd   : > { %830 = vmatprep.subr.bf16.mxu0 %v902_v0  ;;  %s741_s26 = sshll.u32 %s1078_s21, 2  ;;  %v905_v3 = vld [vmem:[%s1069_s1 + $0x20] sm:$0xff]   ;;  %v906_v5 = vld [vmem:[%s1069_s1 + $0x18] sm:$0xff]   ;;  %v915_v7 = vld [vmem:[%s1071_s3 + $0x30] sm:$0xff]  }
   0xe   : > { %831 = vmatpush3.bf16.msra.mxu0 %v902_v0  ;;  %s1006_s29 = scalar_lea.vmem %s1068_s0, %s741_s26  ;;  %v914_v6 = vld [vmem:[%s1071_s3 + $0x38] sm:$0xff]   ;;  %v907_v8 = vld [vmem:[%s1069_s1 + $0x10] sm:$0xff]   ;;  %v916_v9 = vld [vmem:[%s1071_s3 + $0x28] sm:$0xff]   ;;  %s244_s13 = scalar_lea.vmem %s1072_s4, %s741_s26 }
   0xf   : > { %832 = vmatprep.subr.bf16.mxu0 %v903_v1  ;;  %v910_v4 = vld [vmem:[%s1006_s29] sm:$0xff]   ;;  %854 = vmatprep.subr.bf16.mxu1 %v914_v6  ;;  %v908_v10 = vld [vmem:[%s1069_s1 + $0x8] sm:$0xff]   ;;  %v918_v13 = vld [vmem:[%s1071_s3 + $0x18] sm:$0xff]  }
  0x10   : > { %846 = vmatprep.mubr.bf16.mxu0 %v910_v4  ;;  %855 = vmatpush3.bf16.msra.mxu1 %v914_v6  ;;  %v917_v11 = vld [vmem:[%s1071_s3 + $0x20] sm:$0xff]   ;;  %v911_v14 = vld [vmem:[%s1006_s29 + $0x8] sm:$0xff]   ;;  %v912_v15 = vld [vmem:[%s1006_s29 + $0x10] sm:$0xff]  }
  0x11   : > { %856 = vmatprep.subr.bf16.mxu1 %v915_v7  ;;  %v909_v12 = vld [vmem:[%s1069_s1] sm:$0xff]   ;;  %v913_v16 = vld [vmem:[%s1006_s29 + $0x18] sm:$0xff]   ;;  %v919_v17 = vld [vmem:[%s1071_s3 + $0x10] sm:$0xff]  }
  0x12   : > { %833 = vmatpush3.bf16.msra.mxu0 %v903_v1  ;;  %v920_v18 = vld [vmem:[%s1071_s3 + $0x8] sm:$0xff]   ;;  %v921_v19 = vld [vmem:[%s1071_s3] sm:$0xff]  }
  0x13   : > { %834 = vmatprep.subr.bf16.mxu0 %v904_v2  ;;  %v756_v22 = vld [vmem:[%s1070_s2] ss:$0 sm:$0xff] }
  0x14   : > { %857 = vmatpush3.bf16.msra.mxu1 %v915_v7 }
  0x15   : > { %858 = vmatprep.subr.bf16.mxu1 %v916_v9 }
  0x16   : > { %835 = vmatpush3.bf16.msra.mxu0 %v904_v2 }
  0x17   : > { %836 = vmatprep.subr.bf16.mxu0 %v905_v3 }
  0x18   : > { %859 = vmatpush3.bf16.msra.mxu1 %v916_v9 }
  0x19   : > { %860 = vmatprep.subr.bf16.mxu1 %v917_v11 }
  0x1a   : > { %837 = vmatpush3.bf16.msra.mxu0 %v905_v3 }
  0x1b   : > { %838 = vmatprep.subr.bf16.mxu0 %v906_v5 }
  0x1c   : > { %861 = vmatpush3.bf16.msra.mxu1 %v917_v11 }
  0x1d   : > { %862 = vmatprep.subr.bf16.mxu1 %v918_v13 }
  0x1e   : > { %839 = vmatpush3.bf16.msra.mxu0 %v906_v5 }
  0x1f   : > { %840 = vmatprep.subr.bf16.mxu0 %v907_v8 }
  0x20   : > { %863 = vmatpush3.bf16.msra.mxu1 %v918_v13 }
  0x21   : > { %864 = vmatprep.subr.bf16.mxu1 %v919_v17 }
  0x22   : > { %841 = vmatpush3.bf16.msra.mxu0 %v907_v8 }
  0x23   : > { %842 = vmatprep.subr.bf16.mxu0 %v908_v10 }
  0x24   : > { %865 = vmatpush3.bf16.msra.mxu1 %v919_v17 }
  0x25   : > { %866 = vmatprep.subr.bf16.mxu1 %v920_v18 }
  0x26   : > { %843 = vmatpush3.bf16.msra.mxu0 %v908_v10 }
  0x27   : > { %844 = vmatprep.subr.bf16.mxu0 %v909_v12 }
  0x28   : > { %867 = vmatpush3.bf16.msra.mxu1 %v920_v18 }
  0x29   : > { %868 = vmatprep.subr.bf16.mxu1 %v921_v19 }
  0x2a   : > { %845 = vmatpush3.bf16.msra.mxu0 %v909_v12 }
  0x2c   : > { %869 = vmatpush3.bf16.msra.mxu1 %v921_v19 }
  0x2d   : > { %847 = vmatmul.mubr.bf16.vlgmr.msra.gmra.mxu0 %v911_v14 }
  0x2e   : > { %850 = vmatprep.mubr.bf16.mxu0 %v912_v15 }
  0x35   : > { %851 = vmatmul.mubr.bf16.gmra.mxu0 %v913_v16 }
  0xed   : > { %v848_v20 = vpop.f32.mrf.mxu0 }
  0xee   : > { %v464_v26 = vadd.f32 %v848_v20, %v756_v22 }
  0xef   : > { %v397_v21 = vpop.f32.mrf.mxu0 }
  0xf0   : > { %v462_v24 = vadd.f32 %v756_v22, %v397_v21  ;;  %v472_v33 = vmax.f32 %v464_v26, 0.0 }
  0xf1   : > { %v849_v23 = vpop.f32.mrf.mxu0 }
  0xf2   : > { %v465_v25 = vadd.f32 %v849_v23, %v756_v22  ;;  %v470_v31 = vmax.f32 %v462_v24, 0.0 }
  0xf3   : > { %v400_v27 = vpop.f32.mrf.mxu0 }
  0xf4   : > { %v463_v28 = vadd.f32 %v756_v22, %v400_v27  ;;  %v473_v29 = vmax.f32 %v465_v25, 0.0 }
  0xf5   : > { %v852_v30 = vpop.f32.mrf.mxu0 }
  0xf6   : > { %v471_v32 = vmax.f32 %v463_v28, 0.0  ;;  %v479_v36 = vpack.c.bf16 %v473_v29, %v472_v33  ;;  %v468_v40 = vadd.f32 %v852_v30, %v756_v22 }
  0xf7   : > { %v413_v34 = vpop.f32.mrf.mxu0 }
  0xf8   : > { %v478_v35 = vpack.c.bf16 %v471_v32, %v470_v31  ;;  %v466_v38 = vadd.f32 %v756_v22, %v413_v34  ;;  %v476_v46 = vmax.f32 %v468_v40, 0.0 }
  0xf9   : > { %v853_v37 = vpop.f32.mrf.mxu0 }
  0xfa   : > { %v469_v39 = vadd.f32 %v853_v37, %v756_v22  ;;  %870 = vmatprep.mubr.bf16.mxu1 %v478_v35  ;;  %v474_v44 = vmax.f32 %v466_v38, 0.0 }
  0xfb   : > { %v416_v41 = vpop.f32.mrf.mxu0  ;;  %871 = vmatmul.mubr.bf16.vlgmr.msra.gmra.mxu1 %v479_v36 }
  0xfc   : > { %v467_v42 = vadd.f32 %v756_v22, %v416_v41  ;;  %v477_v43 = vmax.f32 %v469_v39, 0.0 }
  0xfe   : > { %v475_v45 = vmax.f32 %v467_v42, 0.0  ;;  %v481_v48 = vpack.c.bf16 %v477_v43, %v476_v46 }
 0x100   : > { %v480_v47 = vpack.c.bf16 %v475_v45, %v474_v44 }
 0x102   : > { %874 = vmatprep.mubr.bf16.mxu1 %v480_v47 }
 0x103   : > { %875 = vmatmul.mubr.bf16.gmra.mxu1 %v481_v48 }
 0x1bb   : > { %v872_v49 = vpop.f32.mrf.mxu1 }
 0x1bd   : > { %v580_v50 = vpop.f32.mrf.mxu1 }
 0x1bf   : > { %v873_v51 = vpop.f32.mrf.mxu1 }
 0x1c0   : > { %v791_v52 = vpack.c.bf16 %v873_v51, %v872_v49 }
 0x1c1   : > { %v583_v53 = vpop.f32.mrf.mxu1 }
 0x1c2   : > { %803 = vst [vmem:[%s244_s13 + $0x8] sm:$0xff] %v791_v52   ;;  %v786_v54 = vpack.c.bf16 %v583_v53, %v580_v50 }
 0x1c3   : > { %v876_v55 = vpop.f32.mrf.mxu1 }
 0x1c4   : > { %787 = vst [vmem:[%s244_s13] sm:$0xff] %v786_v54  }
 0x1c5   : > { %v596_v56 = vpop.f32.mrf.mxu1 }
 0x1c7   : > { %v877_v57 = vpop.f32.mrf.mxu1 }
 0x1c8   : > { %v801_v58 = vpack.c.bf16 %v877_v57, %v876_v55 }
 0x1c9   : > { %v599_v59 = vpop.f32.mrf.mxu1 }
 0x1ca   : > { %805 = vst [vmem:[%s244_s13 + $0x18] sm:$0xff] %v801_v58   ;;  %v796_v60 = vpack.c.bf16 %v599_v59, %v596_v56 }
 0x1cc   : > { %804 = vst [vmem:[%s244_s13 + $0x10] sm:$0xff] %v796_v60  }
 0x1cd PF: > { %s14_s17 = sadd.s32 1, %s944_s17   ;;  %s1073_s15 = smov %s940_s16 }
 0x1ce   : > { %p11_p5 = scmp.ge.s32.totalorder %s14_s17, 4   ;;  %s1074_s16 = smov %s1076_s18 }
 0x1d0   :  { %13 = sbr.rel (!%p11_p5) target bundleno = 2 (0x2), region = 77 }

// kernel: gnn_decoder_forward.3
= control target key start
LH: loop header
LB: loop body
LE: loop exit
PB: predicated region body
PF: predicated region fallthrough
CT: control target
= control target key end

     0   :  { %s1111_s18 = smov 0   ;;  %s1113_s19 = smov 0   ;;  %s1329_s0 = inlined_call_operand.vmem [shape: bf16[128,128], index: 0, kind: input, shape index: {}]   ;;  %s1330_s1 = inlined_call_operand.vmem [shape: bf16[128,128], index: 1, kind: input, shape index: {}]   ;;  %s1331_s2 = inlined_call_operand.vmem [shape: f32[1,128], index: 2, kind: input, shape index: {}]   ;;  %s1332_s3 = inlined_call_operand.vmem [shape: bf16[128,128], index: 3, kind: input, shape index: {}]   ;;  %s1333_s4 = inlined_call_operand.vmem [shape: f32[1,128], index: 4, kind: input, shape index: {}]   ;;  %s1334_s5 = inlined_call_operand.vmem [shape: f32[128,128], index: 5, kind: output, shape index: {}]  }
   0x1   :  { %s1115_s20 = smov 0  }
   0x2 LB: > { %s27_s21 = sadd.s32 1, %s1075_s19  ;;  %p880_p0 = scmp.ge.s32.totalorder %s1079_s20, 1  ;;  %s1079_s20 = sphi %s1115_s20, %s15_s20   ;;  %s1075_s19 = sphi %s1113_s19, %s1344_s19   ;;  %s1071_s18 = sphi %s1111_s18, %s1343_s18  }
   0x3   : > { %p29_p1 = scmp.ge.s32.totalorder %s27_s21, 2  ;;  %p216_p2 = scmp.lt.s32.totalorder %s1079_s20, 3 }
   0x5   : > { %s1346_s21 = smov (%p29_p1, %s27_s21), 0  ;;  %p217_p3 = pnand %p880_p0, %p216_p2 }
   0x6   : > { %s881_s24 = sshll.u32 (!%p217_p3), %s1071_s18, 3 }
   0x7   : > { %220 = sbr.rel (%p217_p3) target bundleno = 505 (0x1f9), region = 40  ;;  %p253_p4 = scmp.lt.s32.totalorder (!%p217_p3), %s881_s24, 15 }
   0xc   : > { %v1005_v0 = vld [vmem:[%s1330_s1 + $0x38] sm:$0xff]   ;;  %v1006_v1 = vld [vmem:[%s1330_s1 + $0x30] sm:$0xff]   ;;  %s1348_s24 = smov (!%p253_p4, %s881_s24), 15  ;;  %v1007_v2 = vld [vmem:[%s1330_s1 + $0x28] sm:$0xff]  }
   0xd   : > { %933 = vmatprep.subr.bf16.mxu0 %v1005_v0  ;;  %s882_s29 = sshll.u32 %s1348_s24, 2  ;;  %v1008_v3 = vld [vmem:[%s1330_s1 + $0x20] sm:$0xff]   ;;  %v1009_v5 = vld [vmem:[%s1330_s1 + $0x18] sm:$0xff]   ;;  %v1018_v7 = vld [vmem:[%s1332_s3 + $0x30] sm:$0xff]   ;;  %s884_s17 = sshll.u32 %s1348_s24, 3 }
   0xe   : > { %934 = vmatpush3.bf16.msra.mxu0 %v1005_v0  ;;  %s1144_s7 = scalar_lea.vmem %s1329_s0, %s882_s29  ;;  %v1017_v6 = vld [vmem:[%s1332_s3 + $0x38] sm:$0xff]   ;;  %v1010_v8 = vld [vmem:[%s1330_s1 + $0x10] sm:$0xff]   ;;  %v1019_v9 = vld [vmem:[%s1332_s3 + $0x28] sm:$0xff]   ;;  %s1262_s22 = scalar_lea.vmem %s1334_s5, %s884_s17 }
   0xf   : > { %935 = vmatprep.subr.bf16.mxu0 %v1006_v1  ;;  %v1013_v4 = vld [vmem:[%s1144_s7] sm:$0xff]   ;;  %957 = vmatprep.subr.bf16.mxu1 %v1017_v6  ;;  %v1011_v10 = vld [vmem:[%s1330_s1 + $0x8] sm:$0xff]   ;;  %v1021_v13 = vld [vmem:[%s1332_s3 + $0x18] sm:$0xff]  }
  0x10   : > { %949 = vmatprep.mubr.bf16.mxu0 %v1013_v4  ;;  %958 = vmatpush3.bf16.msra.mxu1 %v1017_v6  ;;  %v1020_v11 = vld [vmem:[%s1332_s3 + $0x20] sm:$0xff]   ;;  %v1014_v14 = vld [vmem:[%s1144_s7 + $0x8] sm:$0xff]   ;;  %v1015_v15 = vld [vmem:[%s1144_s7 + $0x10] sm:$0xff]  }
  0x11   : > { %959 = vmatprep.subr.bf16.mxu1 %v1018_v7  ;;  %v1012_v12 = vld [vmem:[%s1330_s1] sm:$0xff]   ;;  %v1016_v16 = vld [vmem:[%s1144_s7 + $0x18] sm:$0xff]   ;;  %v1022_v17 = vld [vmem:[%s1332_s3 + $0x10] sm:$0xff]  }
  0x12   : > { %936 = vmatpush3.bf16.msra.mxu0 %v1006_v1  ;;  %v1023_v18 = vld [vmem:[%s1332_s3 + $0x8] sm:$0xff]   ;;  %v1024_v19 = vld [vmem:[%s1332_s3] sm:$0xff]  }
  0x13   : > { %937 = vmatprep.subr.bf16.mxu0 %v1007_v2  ;;  %v897_v22 = vld [vmem:[%s1331_s2] ss:$0 sm:$0xff] }
  0x14   : > { %960 = vmatpush3.bf16.msra.mxu1 %v1018_v7  ;;  %v898_v49 = vld [vmem:[%s1333_s4] ss:$0 sm:$0xff] }
  0x15   : > { %961 = vmatprep.subr.bf16.mxu1 %v1019_v9 }
  0x16   : > { %938 = vmatpush3.bf16.msra.mxu0 %v1007_v2 }
  0x17   : > { %939 = vmatprep.subr.bf16.mxu0 %v1008_v3 }
  0x18   : > { %962 = vmatpush3.bf16.msra.mxu1 %v1019_v9 }
  0x19   : > { %963 = vmatprep.subr.bf16.mxu1 %v1020_v11 }
  0x1a   : > { %940 = vmatpush3.bf16.msra.mxu0 %v1008_v3 }
  0x1b   : > { %941 = vmatprep.subr.bf16.mxu0 %v1009_v5 }
  0x1c   : > { %964 = vmatpush3.bf16.msra.mxu1 %v1020_v11 }
  0x1d   : > { %965 = vmatprep.subr.bf16.mxu1 %v1021_v13 }
  0x1e   : > { %942 = vmatpush3.bf16.msra.mxu0 %v1009_v5 }
  0x1f   : > { %943 = vmatprep.subr.bf16.mxu0 %v1010_v8 }
  0x20   : > { %966 = vmatpush3.bf16.msra.mxu1 %v1021_v13 }
  0x21   : > { %967 = vmatprep.subr.bf16.mxu1 %v1022_v17 }
  0x22   : > { %944 = vmatpush3.bf16.msra.mxu0 %v1010_v8 }
  0x23   : > { %945 = vmatprep.subr.bf16.mxu0 %v1011_v10 }
  0x24   : > { %968 = vmatpush3.bf16.msra.mxu1 %v1022_v17 }
  0x25   : > { %969 = vmatprep.subr.bf16.mxu1 %v1023_v18 }
  0x26   : > { %946 = vmatpush3.bf16.msra.mxu0 %v1011_v10 }
  0x27   : > { %947 = vmatprep.subr.bf16.mxu0 %v1012_v12 }
  0x28   : > { %970 = vmatpush3.bf16.msra.mxu1 %v1023_v18 }
  0x29   : > { %971 = vmatprep.subr.bf16.mxu1 %v1024_v19 }
  0x2a   : > { %948 = vmatpush3.bf16.msra.mxu0 %v1012_v12 }
  0x2c   : > { %972 = vmatpush3.bf16.msra.mxu1 %v1024_v19 }
  0x2d   : > { %950 = vmatmul.mubr.bf16.vlgmr.msra.gmra.mxu0 %v1014_v14 }
  0x2e   : > { %953 = vmatprep.mubr.bf16.mxu0 %v1015_v15 }
  0x35   : > { %954 = vmatmul.mubr.bf16.gmra.mxu0 %v1016_v16 }
  0xed   : > { %v951_v20 = vpop.f32.mrf.mxu0 }
  0xee   : > { %v491_v26 = vadd.f32 %v951_v20, %v897_v22 }
  0xef   : > { %v424_v21 = vpop.f32.mrf.mxu0 }
  0xf0   : > { %v489_v24 = vadd.f32 %v897_v22, %v424_v21  ;;  %v499_v33 = vmax.f32 %v491_v26, 0.0 }
  0xf1   : > { %v952_v23 = vpop.f32.mrf.mxu0 }
  0xf2   : > { %v492_v25 = vadd.f32 %v952_v23, %v897_v22  ;;  %v497_v31 = vmax.f32 %v489_v24, 0.0 }
  0xf3   : > { %v427_v27 = vpop.f32.mrf.mxu0 }
  0xf4   : > { %v490_v28 = vadd.f32 %v897_v22, %v427_v27  ;;  %v500_v29 = vmax.f32 %v492_v25, 0.0 }
  0xf5   : > { %v955_v30 = vpop.f32.mrf.mxu0 }
  0xf6   : > { %v498_v32 = vmax.f32 %v490_v28, 0.0  ;;  %v506_v36 = vpack.c.bf16 %v500_v29, %v499_v33  ;;  %v495_v40 = vadd.f32 %v955_v30, %v897_v22 }
  0xf7   : > { %v440_v34 = vpop.f32.mrf.mxu0 }
  0xf8   : > { %v505_v35 = vpack.c.bf16 %v498_v32, %v497_v31  ;;  %v493_v38 = vadd.f32 %v897_v22, %v440_v34  ;;  %v503_v46 = vmax.f32 %v495_v40, 0.0  ;;  %v773_v31 = vlaneseq }
  0xf9   : > { %v956_v37 = vpop.f32.mrf.mxu0 }
  0xfa   : > { %v496_v39 = vadd.f32 %v956_v37, %v897_v22  ;;  %973 = vmatprep.mubr.bf16.mxu1 %v505_v35  ;;  %v501_v44 = vmax.f32 %v493_v38, 0.0  ;;  %v1221_v37 = vand.u32 127, %v773_v31 }
  0xfb   : > { %v443_v41 = vpop.f32.mrf.mxu0  ;;  %974 = vmatmul.mubr.bf16.vlgmr.msra.gmra.mxu1 %v506_v36 }
  0xfc   : > { %v494_v42 = vadd.f32 %v897_v22, %v443_v41  ;;  %v504_v43 = vmax.f32 %v496_v39, 0.0  ;;  %vm775_vm0 = vcmp.eq.s32.totalorder %v1221_v37, 1 }
  0xfe   : > { %v502_v45 = vmax.f32 %v494_v42, 0.0  ;;  %v508_v48 = vpack.c.bf16 %v504_v43, %v503_v46 }
 0x100   : > { %v507_v47 = vpack.c.bf16 %v502_v45, %v501_v44 }
 0x102   : > { %977 = vmatprep.mubr.bf16.mxu1 %v507_v47 }
 0x103   : > { %978 = vmatmul.mubr.bf16.gmra.mxu1 %v508_v48 }
 0x1bb   : > { %v975_v50 = vpop.f32.mrf.mxu1 }
 0x1bc   : > { %v1195_v51 = vadd.f32 %v975_v50, %v898_v49 }
 0x1bd   : > { %v614_v52 = vpop.f32.mrf.mxu1 }
 0x1be   : > { %v655_v53 = vand.u32 2147483647, %v1195_v51  ;;  %v1198_v54 = vadd.f32 %v898_v49, %v614_v52  ;;  %v647_v42 = vmax.f32 %v1195_v51, 0.0 }
 0x1bf   : > { %v976_v55 = vpop.f32.mrf.mxu1 }
 0x1c0   : > { %v663_v56 = vsub.f32 0.0, %v655_v53  ;;  %v653_v57 = vand.u32 2147483647, %v1198_v54  ;;  %v1201_v58 = vadd.f32 %v976_v55, %v898_v49  ;;  %v645_v43 = vmax.f32 %v1198_v54, 0.0 }
 0x1c1   : > { %v617_v59 = vpop.f32.mrf.mxu1 }
 0x1c2   : > { %v673_v60 = vmul.f32 1.442695, %v663_v56  ;;  %v661_v61 = vsub.f32 0.0, %v653_v57  ;;  %v656_v62 = vand.u32 2147483647, %v1201_v58  ;;  %v1204_v63 = vadd.f32 %v898_v49, %v617_v59 }
 0x1c3   : > { %v979_v0 = vpop.f32.mrf.mxu1  ;;  %v648_v48 = vmax.f32 %v1201_v58, 0.0 }
 0x1c4   : > { %1025 = vpow2.f32 %v673_v60  ;;  %v669_v1 = vmul.f32 1.442695, %v661_v61  ;;  %v664_v2 = vsub.f32 0.0, %v656_v62  ;;  %v1206_v3 = vadd.f32 %v979_v0, %v898_v49 }
 0x1c5   : > { %v654_v4 = vand.u32 2147483647, %v1204_v63  ;;  %v630_v5 = vpop.f32.mrf.mxu1  ;;  %v646_v56 = vmax.f32 %v1204_v63, 0.0 }
 0x1c6   : > { %1027 = vpow2.f32 %v669_v1  ;;  %v675_v6 = vmul.f32 1.442695, %v664_v2  ;;  %v659_v7 = vand.u32 2147483647, %v1206_v3  ;;  %v1210_v9 = vadd.f32 %v898_v49, %v630_v5 }
 0x1c7   : > { %v662_v8 = vsub.f32 0.0, %v654_v4  ;;  %v980_v10 = vpop.f32.mrf.mxu1  ;;  %v651_v57 = vmax.f32 %v1206_v3, 0.0 }
 0x1c8   : > { %1029 = vpow2.f32 %v675_v6  ;;  %v667_v11 = vsub.f32 0.0, %v659_v7  ;;  %v1212_v12 = vadd.f32 %v980_v10, %v898_v49  ;;  %v657_v14 = vand.u32 2147483647, %v1210_v9 }
 0x1c9   : > { %v671_v13 = vmul.f32 1.442695, %v662_v8  ;;  %v633_v15 = vpop.f32.mrf.mxu1  ;;  %v649_v1 = vmax.f32 %v1210_v9, 0.0 }
 0x1ca   : > { %v681_v16 = vmul.f32 1.442695, %v667_v11  ;;  %v660_v17 = vand.u32 2147483647, %v1212_v12  ;;  %v1216_v18 = vadd.f32 %v898_v49, %v633_v15  ;;  %v665_v19 = vsub.f32 0.0, %v657_v14 }
 0x1cb   : > { %1031 = vpow2.f32 %v671_v13 }
 0x1cc   : > { %1033 = vpow2.f32 %v681_v16  ;;  %v668_v20 = vsub.f32 0.0, %v660_v17  ;;  %v658_v21 = vand.u32 2147483647, %v1216_v18  ;;  %v677_v22 = vmul.f32 1.442695, %v665_v19 }
 0x1ce   : > { %v683_v23 = vmul.f32 1.442695, %v668_v20  ;;  %v666_v24 = vsub.f32 0.0, %v658_v21  ;;  %1035 = vpow2.f32 %v677_v22 }
 0x1d0   : > { %1037 = vpow2.f32 %v683_v23  ;;  %v679_v25 = vmul.f32 1.442695, %v666_v24 }
 0x1d1   : > { %v1026_v26 = vpop.eup %1025 }
 0x1d2   : > { %v703_v27 = vadd.f32 1.0, %v1026_v26  ;;  %1039 = vpow2.f32 %v679_v25  ;;  %v706_v36 = vmul.f32 -0.5, %v1026_v26  ;;  %v709_v47 = vand.u32 2147483647, %v1026_v26 }
 0x1d3   : > { %v1028_v28 = vpop.eup %1027 }
 0x1d4   : > { %1041 = vlog2.f32 %v703_v27  ;;  %v685_v29 = vadd.f32 1.0, %v1028_v28  ;;  %v688_v39 = vmul.f32 -0.5, %v1028_v28  ;;  %v707_v46 = vadd.f32 1.0, %v706_v36 }
 0x1d5   : > { %v1030_v30 = vpop.eup %1029  ;;  %v691_v53 = vand.u32 2147483647, %v1028_v28  ;;  %vm710_vm1 = vcmp.lt.f32.partialorder %v709_v47, 0.0004427343 }
 0x1d6   : > { %1043 = vlog2.f32 %v685_v29  ;;  %v712_v32 = vadd.f32 1.0, %v1030_v30  ;;  %v715_v44 = vmul.f32 -0.5, %v1030_v30  ;;  %v689_v52 = vadd.f32 1.0, %v688_v39 }
 0x1d7   : > { %v718_v62 = vand.u32 2147483647, %v1030_v30  ;;  %v708_v4 = vmul.f32 %v1026_v26, %v707_v46  ;;  %vm1241_vm2 = vcmp.lt.f32.partialorder %v691_v53, 0.0004427343 }
 0x1d8   : > { %v1032_v33 = vpop.eup %1031  ;;  %1045 = vlog2.f32 %v712_v32  ;;  %v716_v61 = vadd.f32 1.0, %v715_v44  ;;  %v690_v7 = vmul.f32 %v1028_v28, %v689_v52 }
 0x1d9   : > { %v1219_v34 = vpop.eup %1033  ;;  %v694_v35 = vadd.f32 1.0, %v1032_v33  ;;  %v697_v55 = vmul.f32 -0.5, %v1032_v33  ;;  %v700_v0 = vand.u32 2147483647, %v1032_v33  ;;  %vm1248_vm3 = vcmp.lt.f32.partialorder %v718_v62, 0.0004427343 }
 0x1da   : > { %v739_v38 = vadd.f32 1.0, %v1219_v34  ;;  %v742_v5 = vmul.f32 -0.5, %v1219_v34  ;;  %v745_v14 = vand.u32 2147483647, %v1219_v34  ;;  %v717_v19 = vmul.f32 %v1030_v30, %v716_v61 }
 0x1db   : > { %1047 = vlog2.f32 %v694_v35  ;;  %v1224_v40 = vpop.eup %1035  ;;  %v698_v10 = vadd.f32 1.0, %v697_v55  ;;  %vm1252_vm4 = vcmp.lt.f32.partialorder %v700_v0, 0.0004427343 }
 0x1dc   : > { %1049 = vlog2.f32 %v739_v38  ;;  %v721_v45 = vadd.f32 1.0, %v1224_v40  ;;  %v724_v15 = vmul.f32 -0.5, %v1224_v40  ;;  %v743_v24 = vadd.f32 1.0, %v742_v5 }
 0x1dd   : > { %v1226_v41 = vpop.eup %1037  ;;  %v699_v28 = vmul.f32 %v1032_v33, %v698_v10  ;;  %vm1267_vm5 = vcmp.lt.f32.partialorder %v745_v14, 0.0004427343  ;;  %v727_v36 = vand.u32 2147483647, %v1224_v40 }
 0x1de   : > { %v748_v49 = vadd.f32 1.0, %v1226_v41  ;;  %1051 = vlog2.f32 %v721_v45  ;;  %v751_v25 = vmul.f32 -0.5, %v1226_v41  ;;  %v725_v35 = vadd.f32 1.0, %v724_v15 }
 0x1df   : > { %v1234_v50 = vpop.eup %1039  ;;  %v744_v45 = vmul.f32 %v1219_v34, %v743_v24  ;;  %v754_v47 = vand.u32 2147483647, %v1226_v41  ;;  %vm728_vm6 = vcmp.lt.f32.partialorder %v727_v36, 0.0004427343 }
 0x1e0   : > { %1053 = vlog2.f32 %v748_v49  ;;  %v730_v59 = vadd.f32 1.0, %v1234_v50  ;;  %v733_v29 = vmul.f32 -0.5, %v1234_v50  ;;  %v752_v46 = vadd.f32 1.0, %v751_v25 }
 0x1e1   : > { %v1042_v60 = vpop.eup %1041  ;;  %v726_v34 = vmul.f32 %v1224_v40, %v725_v35  ;;  %vm755_vm7 = vcmp.lt.f32.partialorder %v754_v47, 0.0004427343 }
 0x1e2   : > { %v705_v2 = vmul.f32 0.6931472, %v1042_v60  ;;  %1055 = vlog2.f32 %v730_v59  ;;  %v652_v60 = vmax.f32 %v1212_v12, 0.0  ;;  %v753_v40 = vmul.f32 %v1226_v41, %v752_v46 }
 0x1e3   : > { %v1044_v6 = vpop.eup %1043 }
 0x1e4   : > { %v711_v11 = vsel %vm710_vm1, %v708_v4, %v705_v2  ;;  %v687_v13 = vmul.f32 0.6931472, %v1044_v6  ;;  %v736_v2 = vand.u32 2147483647, %v1234_v50 }
 0x1e5   : > { %v1046_v16 = vpop.eup %1045  ;;  %v759_v17 = vadd.f32 %v711_v11, %v647_v42 }
 0x1e6   : > { %v693_v22 = vsel %vm1241_vm2, %v690_v7, %v687_v13  ;;  %v714_v23 = vmul.f32 0.6931472, %v1046_v16  ;;  %vm737_vm8 = vcmp.lt.f32.partialorder %v736_v2, 0.0004427343 }
 0x1e7   : > { %v767_v26 = vadd.f32 1e-06, %v759_v17  ;;  %v757_v27 = vadd.f32 %v693_v22, %v645_v43 }
 0x1e8   : > { %v1048_v30 = vpop.eup %1047  ;;  %v720_v31 = vsel %vm1248_vm3, %v717_v19, %v714_v23 }
 0x1e9   : > { %v1050_v38 = vpop.eup %1049  ;;  %v778_v39 = vsel %vm775_vm0, %v767_v26, %v1195_v51  ;;  %v765_v33 = vadd.f32 1e-06, %v757_v27  ;;  %v760_v42 = vadd.f32 %v720_v31, %v648_v48  ;;  %v696_v43 = vmul.f32 0.6931472, %v1048_v30 }
 0x1ea   : > { %786 = vst [vmem:[%s1262_s22 + $0x10] sm:$0xff] %v778_v39  ;;  %v741_v44 = vmul.f32 0.6931472, %v1050_v38  ;;  %v734_v51 = vadd.f32 1.0, %v733_v29 }
 0x1eb   : > { %v776_v49 = vsel %vm775_vm0, %v765_v33, %v1198_v54  ;;  %v768_v52 = vadd.f32 1e-06, %v760_v42  ;;  %v702_v53 = vsel %vm1252_vm4, %v699_v28, %v696_v43  ;;  %v1052_v55 = vpop.eup %1051 }
 0x1ec   : > { %784 = vst [vmem:[%s1262_s22] sm:$0xff] %v776_v49  ;;  %v758_v48 = vadd.f32 %v702_v53, %v646_v56  ;;  %v747_v59 = vsel %vm1267_vm5, %v744_v45, %v741_v44  ;;  %v723_v0 = vmul.f32 0.6931472, %v1052_v55 }
 0x1ed   : > { %v1054_v61 = vpop.eup %1053  ;;  %v779_v54 = vsel %vm775_vm0, %v768_v52, %v1201_v58  ;;  %v763_v62 = vadd.f32 %v747_v59, %v651_v57  ;;  %v735_v58 = vmul.f32 %v1234_v50, %v734_v51  ;;  %v650_v50 = vmax.f32 %v1216_v18, 0.0 }
 0x1ee   : > { %787 = vst [vmem:[%s1262_s22 + $0x18] sm:$0xff] %v779_v54  ;;  %v766_v56 = vadd.f32 1e-06, %v758_v48  ;;  %v750_v4 = vmul.f32 0.6931472, %v1054_v61  ;;  %v729_v7 = vsel %vm728_vm6, %v726_v34, %v723_v0 }
 0x1ef   : > { %v1056_v5 = vpop.eup %1055  ;;  %v771_v6 = vadd.f32 1e-06, %v763_v62  ;;  %v761_v8 = vadd.f32 %v729_v7, %v649_v1 }
 0x1f0   : > { %v777_v57 = vsel %vm775_vm0, %v766_v56, %v1204_v63  ;;  %v756_v10 = vsel %vm755_vm7, %v753_v40, %v750_v4  ;;  %v732_v11 = vmul.f32 0.6931472, %v1056_v5 }
 0x1f1   : > { %785 = vst [vmem:[%s1262_s22 + $0x8] sm:$0xff] %v777_v57  ;;  %v782_v41 = vsel %vm775_vm0, %v771_v6, %v1206_v3  ;;  %v764_v13 = vadd.f32 %v756_v10, %v652_v60  ;;  %v769_v14 = vadd.f32 1e-06, %v761_v8 }
 0x1f2   : > { %790 = vst [vmem:[%s1262_s22 + $0x30] sm:$0xff] %v782_v41  ;;  %v738_v15 = vsel %vm737_vm8, %v735_v58, %v732_v11 }
 0x1f3   : > { %v772_v63 = vadd.f32 1e-06, %v764_v13  ;;  %v762_v16 = vadd.f32 %v738_v15, %v650_v50  ;;  %v780_v1 = vsel %vm775_vm0, %v769_v14, %v1210_v9 }
 0x1f4   : > { %788 = vst [vmem:[%s1262_s22 + $0x20] sm:$0xff] %v780_v1 }
 0x1f5   : > { %v783_v17 = vsel %vm775_vm0, %v772_v63, %v1212_v12  ;;  %v770_v19 = vadd.f32 1e-06, %v762_v16 }
 0x1f6   : > { %791 = vst [vmem:[%s1262_s22 + $0x38] sm:$0xff] %v783_v17 }
 0x1f7   : > { %v781_v3 = vsel %vm775_vm0, %v770_v19, %v1216_v18 }
 0x1f8   : > { %789 = vst [vmem:[%s1262_s22 + $0x28] sm:$0xff] %v781_v3 }
 0x1f9 PF: > { %s15_s20 = sadd.s32 1, %s1079_s20   ;;  %s1343_s18 = smov %s1075_s19 }
 0x1fa   : > { %p12_p5 = scmp.ge.s32.totalorder %s15_s20, 4   ;;  %s1344_s19 = smov %s1346_s21 }
 0x1fc   :  { %14 = sbr.rel (!%p12_p5) target bundleno = 2 (0x2), region = 81 }

</bundles_post_ra>
